<compile_context>
chip_gen: v7x
topology: tpu7x:2x2x1
jax: 0.10.0
libtpu: 0.0.40
codegen_flags: <defaults>
</compile_context>

<pallas_src>
import jax
import jax.numpy as jnp
from jax.experimental import pallas as pl
from jax.experimental.pallas import tpu as pltpu

_VMEM_LIMIT = 32 * 1024 * 1024  # default scoped limit on v6e/v7x, safe on v5e


# ----------------------------------------------------------------------------
# Kernel 1: elementwise residual addition (the wrapper's own hot path).
# Lane-dense 2-D layout (last dim 512/256/128) + tiled grid so the pipeliner
# overlaps DMA with the VPU add; mem-bound, so lane density sets throughput.
# ----------------------------------------------------------------------------
def _add_kernel(a_ref, b_ref, o_ref):
    o_ref[...] = a_ref[...] + b_ref[...]


def residual_add(a, b):
    """Elementwise a + b via a tiled, lane-dense Pallas kernel."""
    assert a.shape == b.shape and a.dtype == b.dtype
    orig_shape = a.shape
    total = a.size

    lane = next((l for l in (512, 256, 128) if total % l == 0), None)
    if lane is None:
        # Rare fallback (element count not a multiple of 128): single block.
        a2 = a.reshape(-1, orig_shape[-1])
        b2 = b.reshape(-1, orig_shape[-1])
        out2 = pl.pallas_call(
            _add_kernel, out_shape=jax.ShapeDtypeStruct(a2.shape, a.dtype)
        )(a2, b2)
        return out2.reshape(orig_shape)

    rows = total // lane
    # ~2 MiB per operand block; rows-per-tile kept a multiple of 8 (sublane),
    # so 3 operands x 2 pipeline buffers stays far under the 32 MiB VMEM cap.
    target_rows = max(8, (2 * 1024 * 1024 // (lane * a.dtype.itemsize)) // 8 * 8)
    tile_rows = rows if rows <= target_rows else target_rows

    a2 = a.reshape(rows, lane)
    b2 = b.reshape(rows, lane)
    out2 = pl.pallas_call(
        _add_kernel,
        out_shape=jax.ShapeDtypeStruct((rows, lane), a.dtype),
        grid=(pl.cdiv(rows, tile_rows),),
        in_specs=[
            pl.BlockSpec((tile_rows, lane), lambda i: (i, 0)),
            pl.BlockSpec((tile_rows, lane), lambda i: (i, 0)),
        ],
        out_specs=pl.BlockSpec((tile_rows, lane), lambda i: (i, 0)),
        compiler_params=pltpu.CompilerParams(
            dimension_semantics=("parallel",),  # lets v7x split rows over 2 TCs
            vmem_limit_bytes=_VMEM_LIMIT,
        ),
    )(a2, b2)
    return out2.reshape(orig_shape)


# ----------------------------------------------------------------------------
# Kernel 2: fused "resnet" step of the stand-in up block.
#   out = SiLU( hid @ w_hid + (res [+ extra]) @ w_res + bias )
# The channel concat is replaced by two dots; the wrapper's residual add is
# fused in as `+ extra`.  M (= N*H*W) is tiled; bf16 weights stay resident
# across grid steps; MXU accumulates in f32; SiLU runs in f32 (v5e-friendly).
# ----------------------------------------------------------------------------
def _resnet_fused_kernel(hid_ref, res_ref, extra_ref, wh_ref, wr_ref, b_ref, o_ref):
    skip = res_ref[...].astype(jnp.float32) + extra_ref[...].astype(jnp.float32)
    acc = jnp.dot(hid_ref[...].astype(jnp.bfloat16), wh_ref[...],
                  preferred_element_type=jnp.float32)
    acc = acc + jnp.dot(skip.astype(jnp.bfloat16), wr_ref[...],
                        preferred_element_type=jnp.float32)
    acc = acc + b_ref[...]
    o_ref[...] = (acc * jax.nn.sigmoid(acc)).astype(o_ref.dtype)  # SiLU, f32


def _resnet_kernel(hid_ref, res_ref, wh_ref, wr_ref, b_ref, o_ref):
    acc = jnp.dot(hid_ref[...].astype(jnp.bfloat16), wh_ref[...],
                  preferred_element_type=jnp.float32)
    acc = acc + jnp.dot(res_ref[...].astype(jnp.bfloat16), wr_ref[...],
                        preferred_element_type=jnp.float32)
    acc = acc + b_ref[...]
    o_ref[...] = (acc * jax.nn.sigmoid(acc)).astype(o_ref.dtype)


def fused_resnet_step(hid2, res2, extra2, w_hid, w_res, bias, out_dtype, tm=256):
    """(M,Ch)@(Ch,Co) + (M,Cr)@(Cr,Co) + bias, SiLU.  M tiled, weights resident."""
    m = hid2.shape[0]
    cout = w_hid.shape[1]
    tm = m if m <= tm else tm  # tm is a multiple of 8, or the full M extent

    def row_spec(c):
        return pl.BlockSpec((tm, c), lambda i: (i, 0))

    def full_spec(arr):  # same block every step -> stays resident in VMEM
        return pl.BlockSpec(arr.shape, lambda i: (0, 0))

    if extra2 is None:
        kernel = _resnet_kernel
        inputs = (hid2, res2, w_hid, w_res, bias)
        in_specs = [row_spec(hid2.shape[1]), row_spec(res2.shape[1]),
                    full_spec(w_hid), full_spec(w_res), full_spec(bias)]
    else:
        kernel = _resnet_fused_kernel
        inputs = (hid2, res2, extra2, w_hid, w_res, bias)
        in_specs = [row_spec(hid2.shape[1]), row_spec(res2.shape[1]),
                    row_spec(extra2.shape[1]),
                    full_spec(w_hid), full_spec(w_res), full_spec(bias)]

    return pl.pallas_call(
        kernel,
        out_shape=jax.ShapeDtypeStruct((m, cout), out_dtype),
        grid=(pl.cdiv(m, tm),),
        in_specs=in_specs,
        out_specs=pl.BlockSpec((tm, cout), lambda i: (i, 0)),
        compiler_params=pltpu.CompilerParams(
            dimension_semantics=("parallel",),
            vmem_limit_bytes=_VMEM_LIMIT,
        ),
    )(*inputs)


# ----------------------------------------------------------------------------
# Synthetic stand-in up_block (the real one is injected at construction time).
# TODO(synk): the wrapped up_block is an arbitrary injected diffusers module;
# this is a minimal deterministic UpBlock2D-style stand-in, not its exact graph.
# ----------------------------------------------------------------------------
class SyntheticUpBlock:
    has_cross_attention = False
    accepts_residual_extras = True  # lets the wrapper fuse the residual add

    def __init__(self, channels, num_resnets, key):
        keys = jax.random.split(key, 2 * num_resnets)
        self.params = []
        for i in range(num_resnets):
            w = 0.1 * jax.random.normal(keys[2 * i], (2 * channels, channels), jnp.float32)
            b = 0.1 * jax.random.normal(keys[2 * i + 1], (1, channels), jnp.float32)
            # Split the concat weight into hidden/skip halves (two dots instead
            # of a materialised channel concat) and pre-cast to bf16 once for
            # the MXU; accumulation stays f32.
            self.params.append((w[:channels].astype(jnp.bfloat16),
                                w[channels:].astype(jnp.bfloat16),
                                b))

    @property
    def resnets(self):
        return self.params

    def __call__(self, hidden_states, temb=None, res_hidden_states_tuple=(),
                 residual_extras=None):
        n, c, h, w = hidden_states.shape
        res_list = list(res_hidden_states_tuple)
        extra_list = (list(residual_extras) if residual_extras is not None
                      else [None] * len(res_list))
        out_dtype = hidden_states.dtype

        def to_2d(x):  # NCHW -> channels-last (N*H*W, C); one XLA pass per tensor
            return jnp.transpose(x, (0, 2, 3, 1)).reshape(n * h * w, x.shape[1])

        hid2 = to_2d(hidden_states)
        num = len(self.params)
        for i, (w_hid, w_res, bias) in enumerate(self.params):
            res = res_list.pop()
            extra = extra_list.pop()
            # Intermediate activations stay bf16 between resnets (halves HBM
            # traffic); the last resnet restores the caller-visible dtype.
            step_dtype = out_dtype if i == num - 1 else jnp.bfloat16
            hid2 = fused_resnet_step(
                hid2, to_2d(res), None if extra is None else to_2d(extra),
                w_hid, w_res, bias, step_dtype)

        cout = self.params[-1][0].shape[1]
        hidden = jnp.transpose(hid2.reshape(n, h, w, cout), (0, 3, 1, 2))
        # Nearest 2x upsample as a single broadcast+reshape (one XLA pass).
        # TODO(synk): could be fused into the last conv kernel's store side.
        hidden = jnp.broadcast_to(
            hidden[:, :, :, None, :, None], (n, cout, h, 2, w, 2)
        ).reshape(n, cout, 2 * h, 2 * w)
        return hidden


# ----------------------------------------------------------------------------
# UpBlockWrapper: exact semantics of the PyTorch module's forward.
# ----------------------------------------------------------------------------
class UpBlockWrapper:
    def __init__(self, up_block, residuals):
        self.up_block = up_block
        self.residuals = residuals
        self.has_cross_attention = getattr(up_block, "has_cross_attention", False)

    @property
    def resnets(self):
        return self.up_block.resnets

    def __call__(self, *args, **kwargs):
        res_samples = tuple(kwargs.pop("res_hidden_states_tuple"))
        if getattr(self.up_block, "accepts_residual_extras", False):
            # Fused path: res + extra happens inside the up_block's conv kernel,
            # saving a full HBM round trip per residual tensor.
            k = min(len(res_samples), len(self.residuals))
            return self.up_block(*args, **kwargs,
                                 res_hidden_states_tuple=res_samples[:k],
                                 residual_extras=tuple(self.residuals)[:k])
        # Generic path (any injected up_block): standalone Pallas add kernel.
        res_samples = tuple(
            residual_add(r, e) for r, e in zip(res_samples, self.residuals)
        )
        return self.up_block(*args, **kwargs, res_hidden_states_tuple=res_samples)


if __name__ == "__main__":
    key = jax.random.PRNGKey(0)
    k_hid, k_res0, k_res1, k_ex0, k_ex1, k_blk = jax.random.split(key, 6)

    # Channels chosen >= 128 so matmul lanes and output stores are unmasked
    # (per perf review); still a small overall problem size.
    N, C, H, W = 2, 128, 16, 16
    num_resnets = 2

    hidden = jax.random.normal(k_hid, (N, C, H, W), jnp.float32)
    res_hidden_states_tuple = (
        jax.random.normal(k_res0, (N, C, H, W), jnp.float32),
        jax.random.normal(k_res1, (N, C, H, W), jnp.float32),
    )
    residuals = (
        jax.random.normal(k_ex0, (N, C, H, W), jnp.float32),
        jax.random.normal(k_ex1, (N, C, H, W), jnp.float32),
    )

    up_block = SyntheticUpBlock(C, num_resnets, k_blk)
    wrapper = UpBlockWrapper(up_block, residuals)

    out = wrapper(hidden, res_hidden_states_tuple=res_hidden_states_tuple)
    out = jax.block_until_ready(out)
    assert out.shape == (N, C, 2 * H, 2 * W), out.shape

    # Cross-check the fused path against the spec-literal path: standalone
    # residual_add kernel followed by the unfused up_block call.
    added = tuple(residual_add(r, e)
                  for r, e in zip(res_hidden_states_tuple, residuals))
    ref = up_block(hidden, res_hidden_states_tuple=added)
    ref = jax.block_until_ready(ref)
    assert jnp.allclose(out, ref, atol=1e-4, rtol=1e-4), "fused/unfused mismatch"

    print("KERNEL_OK")
</pallas_src>

<mosaic_0001>
module attributes {stable_mosaic.version = 11 : i64} {
  func.func @_resnet_fused_kernel(%arg0: i32, %arg1: memref<256x128xf32, #tpu.memory_space<vmem>>, %arg2: memref<256x128xf32, #tpu.memory_space<vmem>>, %arg3: memref<256x128xf32, #tpu.memory_space<vmem>>, %arg4: memref<128x128xbf16, #tpu.memory_space<vmem>>, %arg5: memref<128x128xbf16, #tpu.memory_space<vmem>>, %arg6: memref<1x128xf32, #tpu.memory_space<vmem>>, %arg7: memref<256x128xbf16, #tpu.memory_space<vmem>>) attributes {dimension_semantics = [#tpu.dimension_semantics<parallel>], iteration_bounds = array<i64: 2>, scalar_prefetch = 0 : i64, scratch_operands = 0 : i64, tpu.core_type = #tpu.core_type<tc>, window_params = [{transform_indices = @transform_0, window_bounds = array<i64: 256, 128>}, {transform_indices = @transform_1, window_bounds = array<i64: 256, 128>}, {transform_indices = @transform_2, window_bounds = array<i64: 256, 128>}, {pipeline_mode = #tpu.pipeline_mode<synchronous>, transform_indices = @transform_3, window_bounds = array<i64: 128, 128>}, {pipeline_mode = #tpu.pipeline_mode<synchronous>, transform_indices = @transform_4, window_bounds = array<i64: 128, 128>}, {pipeline_mode = #tpu.pipeline_mode<synchronous>, transform_indices = @transform_5, window_bounds = array<i64: 1, 128>}, {transform_indices = @transform_6, window_bounds = array<i64: 256, 128>}]} {
    %c0 = arith.constant 0 : index
    %c0_0 = arith.constant 0 : index
    %0 = vector.load %arg2[%c0, %c0_0] : memref<256x128xf32, #tpu.memory_space<vmem>>, vector<256x128xf32>
    %c0_1 = arith.constant 0 : index
    %c0_2 = arith.constant 0 : index
    %1 = vector.load %arg3[%c0_1, %c0_2] : memref<256x128xf32, #tpu.memory_space<vmem>>, vector<256x128xf32>
    %2 = arith.addf %0, %1 : vector<256x128xf32>
    %c0_3 = arith.constant 0 : index
    %c0_4 = arith.constant 0 : index
    %3 = vector.load %arg1[%c0_3, %c0_4] : memref<256x128xf32, #tpu.memory_space<vmem>>, vector<256x128xf32>
    %4 = arith.truncf %3 : vector<256x128xf32> to vector<256x128xbf16>
    %c0_5 = arith.constant 0 : index
    %c0_6 = arith.constant 0 : index
    %5 = vector.load %arg4[%c0_5, %c0_6] : memref<128x128xbf16, #tpu.memory_space<vmem>>, vector<128x128xbf16>
    %cst = arith.constant dense<0.000000e+00> : vector<256x128xf32>
    %6 = tpu.matmul %4, %5, %cst {dimension_numbers = #tpu.dot_dimension_numbers<[1], [0], [0], [1], [0, 0, 1, 1], [], []>} : vector<256x128xbf16>, vector<128x128xbf16>, vector<256x128xf32> -> vector<256x128xf32>
    %7 = arith.truncf %2 : vector<256x128xf32> to vector<256x128xbf16>
    %c0_7 = arith.constant 0 : index
    %c0_8 = arith.constant 0 : index
    %8 = vector.load %arg5[%c0_7, %c0_8] : memref<128x128xbf16, #tpu.memory_space<vmem>>, vector<128x128xbf16>
    %cst_9 = arith.constant dense<0.000000e+00> : vector<256x128xf32>
    %9 = tpu.matmul %7, %8, %cst_9 {dimension_numbers = #tpu.dot_dimension_numbers<[1], [0], [0], [1], [0, 0, 1, 1], [], []>} : vector<256x128xbf16>, vector<128x128xbf16>, vector<256x128xf32> -> vector<256x128xf32>
    %10 = arith.addf %6, %9 : vector<256x128xf32>
    %c0_10 = arith.constant 0 : index
    %c0_11 = arith.constant 0 : index
    %11 = vector.load %arg6[%c0_10, %c0_11] : memref<1x128xf32, #tpu.memory_space<vmem>>, vector<1x128xf32>
    %12 = vector.broadcast %11 : vector<1x128xf32> to vector<256x128xf32>
    %13 = arith.addf %10, %12 : vector<256x128xf32>
    %14 = arith.negf %13 : vector<256x128xf32>
    %15 = math.exp %14 : vector<256x128xf32>
    %cst_12 = arith.constant 1.000000e+00 : f32
    %16 = vector.broadcast %cst_12 : f32 to vector<256x128xf32>
    %17 = arith.addf %16, %15 : vector<256x128xf32>
    %18 = arith.divf %16, %17 : vector<256x128xf32>
    %19 = arith.mulf %13, %18 : vector<256x128xf32>
    %20 = arith.truncf %19 : vector<256x128xf32> to vector<256x128xbf16>
    %c0_13 = arith.constant 0 : index
    %c0_14 = arith.constant 0 : index
    %21 = vector.load %arg7[%c0_13, %c0_14] : memref<256x128xbf16, #tpu.memory_space<vmem>>, vector<256x128xbf16>
    tpu.vector_store %arg7[%c0_13, %c0_14], %20 {strides = array<i32>} : memref<256x128xbf16, #tpu.memory_space<vmem>>, vector<256x128xbf16>,
    return
  }
  func.func @transform_0(%arg0: i32) -> (i32, i32) {
    %c0_i32 = arith.constant 0 : i32
    %c0_i32_0 = arith.constant 0 : i32
    return %arg0, %c0_i32 : i32, i32
  }
  func.func @transform_1(%arg0: i32) -> (i32, i32) {
    %c0_i32 = arith.constant 0 : i32
    %c0_i32_0 = arith.constant 0 : i32
    return %arg0, %c0_i32 : i32, i32
  }
  func.func @transform_2(%arg0: i32) -> (i32, i32) {
    %c0_i32 = arith.constant 0 : i32
    %c0_i32_0 = arith.constant 0 : i32
    return %arg0, %c0_i32 : i32, i32
  }
  func.func @transform_3(%arg0: i32) -> (i32, i32) {
    %c0_i32 = arith.constant 0 : i32
    %c0_i32_0 = arith.constant 0 : i32
    %c0_i32_1 = arith.constant 0 : i32
    return %c0_i32, %c0_i32_0 : i32, i32
  }
  func.func @transform_4(%arg0: i32) -> (i32, i32) {
    %c0_i32 = arith.constant 0 : i32
    %c0_i32_0 = arith.constant 0 : i32
    %c0_i32_1 = arith.constant 0 : i32
    return %c0_i32, %c0_i32_0 : i32, i32
  }
  func.func @transform_5(%arg0: i32) -> (i32, i32) {
    %c0_i32 = arith.constant 0 : i32
    %c0_i32_0 = arith.constant 0 : i32
    %c0_i32_1 = arith.constant 0 : i32
    return %c0_i32, %c0_i32_0 : i32, i32
  }
  func.func @transform_6(%arg0: i32) -> (i32, i32) {
    %c0_i32 = arith.constant 0 : i32
    %c0_i32_0 = arith.constant 0 : i32
    return %arg0, %c0_i32 : i32, i32
  }
}

</mosaic_0001>

<bundles_post_ra>
// kernel: tpu_custom_call.1
= control target key start
LH: loop header
LB: loop body
LE: loop exit
PB: predicated region body
PF: predicated region fallthrough
CT: control target
= control target key end

     0   :  { %s3085_s0 = inlined_call_operand.hbm [shape: f32[512,128], index: 0, kind: input, shape index: {}]   ;;  %s3086_s1 = inlined_call_operand.hbm [shape: f32[512,128], index: 1, kind: input, shape index: {}]   ;;  %s3087_s2 = inlined_call_operand.hbm [shape: f32[512,128], index: 2, kind: input, shape index: {}]   ;;  %s3088_s3 = inlined_call_operand.hbm [shape: bf16[128,128], index: 3, kind: input, shape index: {}]   ;;  %s3089_s4 = inlined_call_operand.hbm [shape: bf16[128,128], index: 4, kind: input, shape index: {}]   ;;  %s3090_s5 = inlined_call_operand.vmem [shape: f32[1,128], index: 5, kind: input, shape index: {}]   ;;  %s3091_s6 = inlined_call_operand.hbm [shape: bf16[512,128], index: 6, kind: output, shape index: {}]  }
   0x1   :  { %3110 = sst [smem:[#allocation20_spill]] %s3086_s1 }
   0x2   :  { %3111 = sst [smem:[#allocation21_spill]] %s3088_s3 }
   0x3   :  { %11 = vsyncpa [#allocation3], 0 }
   0x4   :  { %13 = vsyncpa [#allocation3 + $0x1], 0 }
   0x5   :  { %14 = vsyncpa [#allocation6], 0 }
   0x6   :  { %16 = vsyncpa [#allocation6 + $0x1], 0 }
   0x7   :  { %17 = vsyncpa [#allocation9], 0 }
   0x8   :  { %18 = vsyncpa [#allocation4], 0 }
   0x9   :  { %20 = vsyncpa [#allocation4 + $0x1], 0  ;;  %s2473_s21 = smov 0   ;;  %s2475_s22 = smov 0  }
   0xa   :  { %s2477_s23 = smov 0   ;;  %s2479_s24 = smov 0  }
   0xb LB: > { %3112 = sst [smem:[#allocation16_spill]] %s2424_s24  ;;  %s2494_s25 = sadd.s32 4294967295, %s2424_s24   ;;  %s2424_s24 = sphi %s2479_s24, %s3145_s24   ;;  %s2420_s23 = sphi %s2477_s23, %s3149_s23   ;;  %s2416_s22 = sphi %s2475_s22, %s3148_s22   ;;  %s2412_s21 = sphi %s2473_s21, %s3147_s21  }
   0xc   : > { %s1563_s26 = sadd.s32 4294967294, %s2424_s24   ;;  %s2498_s27 = sadd.s32 1, %s2424_s24  }
   0xd   : > { %3113 = sst [smem:[#allocation17_spill]] %s2498_s27  ;;  %s33_s28 = sadd.s32 1, %s2420_s23 }
   0xe   : > { %s30_s29 = ssub.s32 %s2424_s24, %s2498_s27  ;;  %p40_p0 = scmp.ne.s32.totalorder %s2420_s23, %s2416_s22 }
   0xf   : > { %p31_p1 = scmp.eq.s32.totalorder %s30_s29, 0  ;;  %p41_p2 = scmp.eq.s32.totalorder %s2424_s24, 0 }
  0x10   : > { %p46_p3 = scmp.ne.s32.totalorder %s2416_s22, %s2412_s21  ;;  %p3092_p4 = scmp.eq.s32.totalorder %s2494_s25, 0 }
  0x11   : > { %s2510_s30 = scalar_select %p31_p1, %s2420_s23, %s33_s28  }
  0x12   : > { %p2512_p5 = por %p41_p2, %p40_p0  ;;  %p2518_p6 = por %p3092_p4, %p46_p3 }
  0x13   : > { %3114 = sst [smem:[#allocation18_spill]] %s2510_s30  ;;  %p185_p7 = scmp.eq.s32.totalorder %s2494_s25, 1 }
  0x14   : > { %s3115_s7 = scalar_select %p2512_p5, 1, 0 }
  0x15   : > { %s3116_s8 = scalar_select %p2518_p6, 1, 0 }
  0x16   : > { %p191_p8 = scmp.eq.s32.totalorder %s1563_s26, 1  ;;  %p1564_p9 = scmp.ge.s32.totalorder %s2424_s24, 1 }
  0x17   : > { %p198_p10 = scmp.lt.s32.totalorder %s2424_s24, 3  ;;  %p2525_p11 = por %p185_p7, %p40_p0 }
  0x18   : > { %p2529_p12 = por %p191_p8, %p46_p3  ;;  %s2426_s12 = smov [#allocation8]  }
  0x19   : > { %s3117_s9 = scalar_select %p2525_p11, 1, 0 }
  0x1a   : > { %s3118_s10 = scalar_select %p2529_p12, 1, 0 }
  0x1b   : > { %p2533_p13 = pnand %p1564_p9, %p198_p10  ;;  %s210_s13 = sshll.u32 %s2426_s12, 4  ;;  %s211_s13 = int_to_ptr.vmem [resolvable:$true] %s210_s13 }
  0x1c   : > { %3119 = sst [smem:[#allocation19_spill]] %s3118_s10  ;;  %s3096_s15 = sand.u32 1, %s2420_s23  }
  0x1d   : > { %s3120_s11 = scalar_select %p2533_p13, 1, 0 }
  0x1e   : > { %p1993_p1 = pneg %p2533_p13  ;;  %s2550_s16 = sshll.u32 %s3096_s15, 8 }
  0x1f   : > { %s3122_s3 = sld [smem:[#allocation21_spill]] }
  0x20   : > { %p2541_p2 = pnand %p1993_p1, %p3092_p4 }
  0x22   : > { %s3121_s14 = scalar_select %p2541_p2, 1, 0 }
  0x23   : > { %p3099_p8 = pneg %p2541_p2 }
  0x25   : > { %s2204_s19 = scalar_lea.hbm %s3122_s3, 1024 }
  0x26   : > { %p2205_p7 = scmp.ne.s32.totalorder %s3122_s3, %s2204_s19  ;;  %p2211_p1 = scmp.lt.u32.totalorder %s2204_s19, %s3122_s3 }
  0x28   : > { %p2207_p9 = pnand %p3099_p8, %p2205_p7 }
  0x2a   : > { %p2208_p10 = pneg %p2207_p9 }
  0x2c   : > { %p2213_p0 = pnand %p2211_p1, %p2208_p10 }
  0x2e   : > { %2216 = shalt.err (!%p2213_p0)
}
  0x2f   : > { %s2217_s12 = scalar_lea.vmem %s211_s13, 1024  ;;  %p2225_p11 = scmp.lt.s32.totalorder %s211_s13, %s211_s13 }
  0x30   : > { %p2218_p4 = scmp.ne.s32.totalorder %s211_s13, %s2217_s12  ;;  %p2226_p6 = scmp.lt.s32.totalorder %s2217_s12, %s2217_s12 }
  0x32   : > { %p2220_p3 = pnand %p2218_p4, %p3099_p8  ;;  %p2227_p13 = por %p2226_p6, %p2225_p11 }
  0x34   : > { %p2221_p12 = pneg %p2220_p3 }
  0x36   : > { %p2228_p5 = pnand %p2227_p13, %p2221_p12 }
  0x38   : > { %2231 = shalt.err (!%p2228_p5)
}
  0x39   : > { %s3097_s17 = smov 64   ;;  %s3098_s18 = smov 4  }
  0x3a   : > { %1996 = dma.hbm_to_vmem [thread:$0]  (!%p2541_p2), %s3122_s3, 1024, %s211_s13, [#allocation9], %s3097_s17, %s3097_s17, %s3098_s18  }
  0x3b   : > { %s2578_s26 = sshll.u32 %s2424_s24, 12  ;;  %p3123_p4 = scmp.ne.s32.totalorder %s3115_s7, 0 }
  0x3c   : > { %p3124_p5 = scmp.lt.s32.totalorder %s2424_s24, 2  ;;  %s261_s29 = sand.u32 1, %s2424_s24  }
  0x3d   : > { %s3126_s1 = sld [smem:[#allocation20_spill]]  ;;  %s265_s13 = scalar_lea.vmem [#allocation5], %s2550_s16 }
  0x3e   : > { %p2584_p6 = pnand %p3124_p5, %p3123_p4  ;;  %s272_s19 = sshll.u32 %s265_s13, 4  ;;  %s2596_s19 = int_to_ptr.vmem [resolvable:$true] %s272_s19 }
  0x3f   : > { %s2598_s7 = scalar_lea.sflag [#allocation6], %s261_s29 }
  0x40   : > { %s3125_s28 = scalar_select %p2584_p6, 1, 0 }
  0x41   : > { %p2604_p12 = pneg %p2584_p6 }
  0x43   : > { %s2593_s30 = scalar_lea.hbm %s3126_s1, %s2578_s26  ;;  %s2237_s18 = scalar_lea.hbm %s3126_s1, 8192 }
  0x44   : > { %s2232_s20 = scalar_lea.hbm %s2593_s30, 4096  ;;  %p2238_p3 = scmp.lt.u32.totalorder %s2593_s30, %s3126_s1 }
  0x45   : > { %p2233_p11 = scmp.ne.s32.totalorder %s2593_s30, %s2232_s20  ;;  %p2239_p7 = scmp.lt.u32.totalorder %s2237_s18, %s2232_s20 }
  0x46   : > { %s3127_s17 = scalar_select %p2604_p12, 1, 0 }
  0x47   : > { %p2235_p13 = pnand %p2604_p12, %p2233_p11  ;;  %p2240_p9 = por %p2239_p7, %p2238_p3 }
  0x48   : > { %p2241_p10 = scmp.lt.u32.totalorder %s2232_s20, %s2593_s30 }
  0x49   : > { %p2236_p0 = pneg %p2235_p13 }
  0x4a   : > { %p2242_p1 = por %p2241_p10, %p2240_p9 }
  0x4c   : > { %p2243_p4 = pnand %p2242_p1, %p2236_p0 }
  0x4e   : > { %2246 = shalt.err (!%p2243_p4)
}
  0x4f   : > { %s2247_s29 = scalar_lea.vmem %s2596_s19, 4096  ;;  %s2429_s15 = smov [#allocation5]  }
  0x50   : > { %p2248_p5 = scmp.ne.s32.totalorder %s2596_s19, %s2247_s29  ;;  %s2252_s12 = sshll.u32 %s2429_s15, 4  ;;  %s2253_s12 = int_to_ptr.vmem [resolvable:$false] %s2252_s12 }
  0x51   : > { %s2254_s3 = scalar_lea.vmem %s2253_s12, 8192  ;;  %p2255_p8 = scmp.lt.s32.totalorder %s2596_s19, %s2253_s12 }
  0x52   : > { %p2250_p11 = pnand %p2248_p5, %p2604_p12  ;;  %p2256_p2 = scmp.lt.s32.totalorder %s2254_s3, %s2247_s29 }
  0x54   : > { %p2251_p13 = pneg %p2250_p11  ;;  %p2257_p3 = por %p2256_p2, %p2255_p8 }
  0x56   : > { %p2258_p7 = pnand %p2257_p3, %p2251_p13 }
  0x58   : > { %2261 = shalt.err (!%p2258_p7)
}
  0x59   : > { %s2430_s18 = smov 128   ;;  %s2431_s20 = smov 8  }
  0x5a   : > { %2006 = dma.hbm_to_vmem [thread:$0]  (!%p2584_p6), %s2593_s30, 4096, %s2596_s19, %s2598_s7, %s2430_s18, %s2430_s18, %s2431_s20  }
  0x5b   : > { %s2432_s13 = smov [#allocation10]   ;;  %s2262_s3 = scalar_lea.hbm %s3089_s4, 1024 }
  0x5c   : > { %s223_s15 = sshll.u32 %s2432_s13, 4  ;;  %p2263_p2 = scmp.ne.s32.totalorder %s3089_s4, %s2262_s3  ;;  %s224_s15 = int_to_ptr.vmem [resolvable:$true] %s223_s15 }
  0x5d   : > { %p3128_p8 = scmp.ne.s32.totalorder %s3121_s14, 0  ;;  %p2269_p1 = scmp.lt.u32.totalorder %s2262_s3, %s3089_s4 }
  0x5f   : > { %p3129_p0 = pneg %p3128_p8 }
  0x61   : > { %p2265_p9 = pnand %p2263_p2, %p3129_p0 }
  0x63   : > { %p2266_p10 = pneg %p2265_p9 }
  0x65   : > { %p2271_p4 = pnand %p2269_p1, %p2266_p10 }
  0x67   : > { %2274 = shalt.err (!%p2271_p4)
}
  0x68   : > { %s2275_s30 = scalar_lea.vmem %s224_s15, 1024  ;;  %p3130_p11 = pmov %p3129_p0 }
  0x69   : > { %p2276_p5 = scmp.ne.s32.totalorder %s224_s15, %s2275_s30  ;;  %p2283_p7 = scmp.lt.s32.totalorder %s224_s15, %s224_s15 }
  0x6a   : > { %p2284_p6 = scmp.lt.s32.totalorder %s2275_s30, %s2275_s30 }
  0x6b   : > { %p2278_p13 = pnand %p2276_p5, %p3130_p11 }
  0x6c   : > { %p2285_p12 = por %p2284_p6, %p2283_p7 }
  0x6d   : > { %p2279_p3 = pneg %p2278_p13 }
  0x6f   : > { %p2286_p0 = pnand %p2285_p12, %p2279_p3 }
  0x71   : > { %2289 = shalt.err (!%p2286_p0)
}
  0x72   : > { %s3131_s1 = smov 4   ;;  %s3132_s27 = smov 64  }
  0x73   : > { %1999 = dma.hbm_to_vmem [thread:$0]  (!%p3128_p8), %s3089_s4, 1024, %s224_s15, [#allocation9], %s3132_s27, %s3132_s27, %s3131_s1  }
  0x74   : > { %s2658_s12 = scalar_lea.hbm %s3085_s0, %s2578_s26  ;;  %s244_s14 = scalar_lea.vmem [#allocation2], %s2550_s16 }
  0x75   : > { %s251_s29 = sshll.u32 %s244_s14, 4  ;;  %s3133_s3 = sand.u32 1, %s2420_s23   ;;  %s2661_s29 = int_to_ptr.vmem [resolvable:$true] %s251_s29 }
  0x76   : > { %s2665_s30 = scalar_lea.sflag [#allocation3], %s3133_s3  ;;  %s2290_s24 = scalar_lea.hbm %s2658_s12, 4096 }
  0x77   : > { %p2291_p6 = scmp.ne.s32.totalorder %s2658_s12, %s2290_s24  ;;  %p3134_p12 = scmp.ne.s32.totalorder %s3127_s17, 0 }
  0x78   : > { %s2295_s27 = scalar_lea.hbm %s3085_s0, 8192  ;;  %p2296_p9 = scmp.lt.u32.totalorder %s2658_s12, %s3085_s0 }
  0x79   : > { %p2293_p2 = pnand %p2291_p6, %p3134_p12  ;;  %p2297_p10 = scmp.lt.u32.totalorder %s2295_s27, %s2290_s24 }
  0x7a   : > { %p2299_p4 = scmp.lt.u32.totalorder %s2290_s24, %s2658_s12 }
  0x7b   : > { %p2294_p8 = pneg %p2293_p2  ;;  %p2298_p1 = por %p2297_p10, %p2296_p9 }
  0x7d   : > { %p2300_p5 = por %p2299_p4, %p2298_p1 }
  0x7f   : > { %p2301_p11 = pnand %p2300_p5, %p2294_p8 }
  0x81   : > { %2304 = shalt.err (!%p2301_p11)
}
  0x82   : > { %s2305_s13 = scalar_lea.vmem %s2661_s29, 4096  ;;  %s2433_s14 = smov [#allocation2]  }
  0x83   : > { %p2306_p13 = scmp.ne.s32.totalorder %s2661_s29, %s2305_s13  ;;  %s2310_s3 = sshll.u32 %s2433_s14, 4  ;;  %s2311_s3 = int_to_ptr.vmem [resolvable:$false] %s2310_s3 }
  0x84   : > { %s2312_s15 = scalar_lea.vmem %s2311_s3, 8192  ;;  %p2313_p0 = scmp.lt.s32.totalorder %s2661_s29, %s2311_s3 }
  0x85   : > { %p2308_p3 = pnand %p2306_p13, %p3134_p12  ;;  %p2314_p6 = scmp.lt.s32.totalorder %s2312_s15, %s2305_s13 }
  0x87   : > { %p2309_p7 = pneg %p2308_p3  ;;  %p2315_p2 = por %p2314_p6, %p2313_p0 }
  0x89   : > { %p2316_p9 = pnand %p2315_p2, %p2309_p7 }
  0x8b   : > { %2319 = shalt.err (!%p2316_p9)
}
  0x8c   : > { %p3135_p8 = scmp.ne.s32.totalorder %s3125_s28, 0  ;;  %s2696_s27 = scalar_lea.hbm %s3087_s2, %s2578_s26 }
  0x8d   : > { %s286_s10 = scalar_lea.vmem [#allocation7], %s2550_s16  ;;  %s2320_s13 = scalar_lea.hbm %s2696_s27, 4096 }
  0x8e   : > { %2003 = dma.hbm_to_vmem [thread:$0]  (!%p3135_p8), %s2658_s12, 4096, %s2661_s29, %s2665_s30, %s2430_s18, %s2430_s18, %s2431_s20  }
  0x8f   : > { %s293_s19 = sshll.u32 %s286_s10, 4  ;;  %p2321_p10 = scmp.ne.s32.totalorder %s2696_s27, %s2320_s13  ;;  %s2699_s19 = int_to_ptr.vmem [resolvable:$true] %s293_s19 }
  0x90   : > { %s2325_s29 = scalar_lea.hbm %s3087_s2, 8192  ;;  %p2326_p5 = scmp.lt.u32.totalorder %s2696_s27, %s3087_s2 }
  0x91   : > { %p2323_p1 = pnand %p2321_p10, %p3134_p12  ;;  %p2327_p11 = scmp.lt.u32.totalorder %s2325_s29, %s2320_s13 }
  0x92   : > { %p2329_p3 = scmp.lt.u32.totalorder %s2320_s13, %s2696_s27 }
  0x93   : > { %p2324_p4 = pneg %p2323_p1  ;;  %p2328_p13 = por %p2327_p11, %p2326_p5 }
  0x95   : > { %p2330_p7 = por %p2329_p3, %p2328_p13 }
  0x97   : > { %p2331_p0 = pnand %p2330_p7, %p2324_p4 }
  0x99   : > { %2334 = shalt.err (!%p2331_p0)
}
  0x9a   : > { %s2335_s16 = scalar_lea.vmem %s2699_s19, 4096  ;;  %s2434_s3 = smov [#allocation7]  }
  0x9b   : > { %p2336_p6 = scmp.ne.s32.totalorder %s2699_s19, %s2335_s16  ;;  %s2340_s15 = sshll.u32 %s2434_s3, 4  ;;  %s2341_s15 = int_to_ptr.vmem [resolvable:$false] %s2340_s15 }
  0x9c   : > { %s2342_s24 = scalar_lea.vmem %s2341_s15, 8192  ;;  %p2343_p10 = scmp.lt.s32.totalorder %s2699_s19, %s2341_s15 }
  0x9d   : > { %p2338_p2 = pnand %p2336_p6, %p3134_p12  ;;  %p2344_p1 = scmp.lt.s32.totalorder %s2342_s24, %s2335_s16 }
  0x9f   : > { %p2339_p9 = pneg %p2338_p2  ;;  %p2345_p5 = por %p2344_p1, %p2343_p10 }
  0xa1   : > { %p2346_p11 = pnand %p2345_p5, %p2339_p9 }
  0xa3   : > { %2349 = shalt.err (!%p2346_p11)
}
  0xa4   : > { %2009 = dma.hbm_to_vmem [thread:$0]  (!%p3135_p8), %s2696_s27, 4096, %s2699_s19, %s2598_s7, %s2430_s18, %s2430_s18, %s2431_s20  }
  0xa5   : > { %p3136_p12 = scmp.ne.s32.totalorder %s3120_s11, 0 }
  0xa6   : > { %s2729_s17 = sand.u32 (!%p3136_p12), 1, %s2416_s22   ;;  %p3137_p4 = scmp.ne.s32.totalorder (!%p3136_p12), %s3116_s8, 0 }
  0xa7   : > { %305 = sbr.rel (%p3136_p12) target bundleno = 540 (0x21c), region = 44  ;;  %s1578_s1 = sshll.u32 (!%p3136_p12), %s2729_s17, 8 }
  0xa8   : > { %s308_s10 = scalar_lea.sflag (!%p3136_p12), [#allocation3], %s2729_s17  ;;  %s2733_s13 = scalar_lea.vmem (!%p3136_p12), [#allocation2], %s1578_s1 }
  0xae   : > { %2395 = dma.done.wait (%p3137_p4), %s308_s10, 4096  }
  0xaf   : > { %2397 = vsyncadd (%p3137_p4), %s308_s10, 4294963200  ;;  %s316_s28 = sand.u32 1, %s2494_s25   ;;  %s2740_s7 = scalar_lea.vmem [#allocation5], %s1578_s1 }
  0xb0   : > { %s317_s11 = scalar_lea.sflag [#allocation6], %s316_s28 }
  0xb1   : > { %2399 = dma.done.wait (%p3137_p4), %s317_s11, 8192  }
  0xb2   : > { %2401 = vsyncadd (%p3137_p4), %s317_s11, 4294959104  ;;  %s2746_s18 = scalar_lea.vmem [#allocation7], %s1578_s1  ;;  %p3138_p8 = scmp.eq.s32.totalorder %s2494_s25, 0 }
  0xb4   : > { %2403 = dma.done.wait (%p3138_p8), [#allocation9], 2048   ;;  %p3139_p13 = pmov %p3138_p8 }
  0xb5   : > { %v2060_v0 = vld [vmem:[#allocation10] sm:$0xff]   ;;  %v2062_v2 = vld [vmem:[#allocation10 + $0x8] sm:$0xff]   ;;  %v2064_v4 = vld [vmem:[#allocation10 + $0x10] sm:$0xff]   ;;  %s1583_s27 = sshll.u32 %s2729_s17, 7  ;;  %s1705_s14 = sshll.u32 %s2494_s25, 11 }
  0xb6   : > { %2405 = vsyncadd (%p3139_p13), [#allocation9], 4294965248  ;;  %v2061_v1 = vld [vmem:[#allocation8] sm:$0xff]   ;;  %1849 = vmatprep.subr.bf16.mxu1 %v2060_v0  ;;  %v2063_v3 = vld [vmem:[#allocation8 + $0x8] sm:$0xff]   ;;  %s2930_s19 = scalar_lea.vmem [#allocation11], %s1583_s27  ;;  %s3037_s26 = scalar_lea.hbm %s3091_s6, %s1705_s14 }
  0xb7   : > { %1897 = vmatprep.subr.bf16.mxu0 %v2061_v1  ;;  %1850 = vmatpush3.bf16.msra.mxu1 %v2060_v0  ;;  %v2065_v5 = vld [vmem:[#allocation8 + $0x10] sm:$0xff]   ;;  %v2066_v6 = vld [vmem:[#allocation10 + $0x18] sm:$0xff]   ;;  %v2068_v8 = vld [vmem:[#allocation10 + $0x20] sm:$0xff]   ;;  %s1428_s12 = sshll.u32 %s2930_s19, 4  ;;  %s1415_s25 = scalar_lea.sflag [#allocation4], %s2729_s17  ;;  %s3039_s12 = int_to_ptr.vmem [resolvable:$true] %s1428_s12 }
  0xb8   : > { %1898 = vmatpush3.bf16.msra.mxu0 %v2061_v1  ;;  %1851 = vmatprep.subr.bf16.mxu1 %v2062_v2  ;;  %v2067_v7 = vld [vmem:[#allocation8 + $0x18] sm:$0xff]   ;;  %v2069_v9 = vld [vmem:[#allocation8 + $0x20] sm:$0xff]   ;;  %v2070_v10 = vld [vmem:[#allocation10 + $0x28] sm:$0xff]   ;;  %s2350_s16 = scalar_lea.vmem %s3039_s12, 2048  ;;  %p3140_p7 = scmp.ne.s32.totalorder %s3117_s9, 0 }
  0xb9   : > { %1899 = vmatprep.subr.bf16.mxu0 %v2063_v3  ;;  %v2071_v11 = vld [vmem:[#allocation8 + $0x28] sm:$0xff]   ;;  %v381_v12 = vld [vmem:[%s2740_s7] sm:$0xff]  ;;  %v2072_v21 = vld [vmem:[#allocation10 + $0x30] sm:$0xff]   ;;  %p2351_p3 = scmp.ne.s32.totalorder %s3039_s12, %s2350_s16  ;;  %s2435_s3 = smov [#allocation11]  }
  0xba   : > { %v382_v13 = vld [vmem:[%s2740_s7 + $0x8] sm:$0xff]  ;;  %v413_v14 = vld [vmem:[%s2746_s18] sm:$0xff]  ;;  %v2073_v23 = vld [vmem:[#allocation8 + $0x30] sm:$0xff]   ;;  %s2354_s15 = sshll.u32 %s2435_s3, 4  ;;  %s2355_s15 = int_to_ptr.vmem [resolvable:$false] %s2354_s15 }
  0xbb   : > { %1852 = vmatpush3.bf16.msra.mxu1 %v2062_v2  ;;  %v414_v15 = vld [vmem:[%s2746_s18 + $0x8] sm:$0xff]  ;;  %v445_v16 = vadd.f32 %v413_v14, %v381_v12  ;;  %v477_v17 = vld [vmem:[%s2733_s13] sm:$0xff]  ;;  %v2074_v24 = vld [vmem:[#allocation10 + $0x38] sm:$0xff]   ;;  %p2352_p0 = pnand %p2351_p3, %p3140_p7  ;;  %s2356_s24 = scalar_lea.vmem %s2355_s15, 4096 }
  0xbc   : > { %1900 = vmatpush3.bf16.msra.mxu0 %v2063_v3  ;;  %1853 = vmatprep.subr.bf16.mxu1 %v2064_v4  ;;  %v478_v18 = vld [vmem:[%s2733_s13 + $0x8] sm:$0xff]  ;;  %v446_v19 = vadd.f32 %v414_v15, %v382_v13  ;;  %v383_v25 = vld [vmem:[%s2740_s7 + $0x10] sm:$0xff]  ;;  %v384_v26 = vld [vmem:[%s2740_s7 + $0x18] sm:$0xff]  ;;  %p2357_p2 = scmp.lt.s32.totalorder %s3039_s12, %s2355_s15  ;;  %p2358_p9 = scmp.lt.s32.totalorder %s2356_s24, %s2350_s16 }
  0xbd   : > { %1901 = vmatprep.subr.bf16.mxu0 %v2065_v5  ;;  %v509_v20 = vpack.c.bf16 %v478_v18, %v477_v17  ;;  %v415_v27 = vld [vmem:[%s2746_s18 + $0x10] sm:$0xff]  ;;  %v416_v28 = vld [vmem:[%s2746_s18 + $0x18] sm:$0xff]  ;;  %v385_v29 = vld [vmem:[%s2740_s7 + $0x20] sm:$0xff]  ;;  %p2353_p6 = pneg %p2352_p0 }
  0xbe   : > { %v541_v22 = vpack.c.bf16 %v446_v19, %v445_v16  ;;  %v386_v30 = vld [vmem:[%s2740_s7 + $0x28] sm:$0xff]  ;;  %v417_v31 = vld [vmem:[%s2746_s18 + $0x20] sm:$0xff]  ;;  %v2075_v33 = vld [vmem:[#allocation8 + $0x38] sm:$0xff]   ;;  %v447_v34 = vadd.f32 %v415_v27, %v383_v25  ;;  %v448_v35 = vadd.f32 %v416_v28, %v384_v26  ;;  %p2359_p10 = por %p2358_p9, %p2357_p2 }
  0xbf   : > { %1854 = vmatpush3.bf16.msra.mxu1 %v2064_v4  ;;  %1913 = vmatprep.mubr.bf16.mxu0 %v509_v20  ;;  %v418_v32 = vld [vmem:[%s2746_s18 + $0x28] sm:$0xff]  ;;  %v449_v36 = vadd.f32 %v417_v31, %v385_v29  ;;  %v479_v38 = vld [vmem:[%s2733_s13 + $0x10] sm:$0xff]  ;;  %v480_v39 = vld [vmem:[%s2733_s13 + $0x18] sm:$0xff] }
  0xc0   : > { %1902 = vmatpush3.bf16.msra.mxu0 %v2065_v5  ;;  %1855 = vmatprep.subr.bf16.mxu1 %v2066_v6  ;;  %v450_v37 = vadd.f32 %v418_v32, %v386_v30  ;;  %v481_v40 = vld [vmem:[%s2733_s13 + $0x20] sm:$0xff]  ;;  %v482_v41 = vld [vmem:[%s2733_s13 + $0x28] sm:$0xff]  ;;  %v542_v42 = vpack.c.bf16 %v448_v35, %v447_v34  ;;  %v387_v43 = vld [vmem:[%s2740_s7 + $0x30] sm:$0xff]  ;;  %v510_v45 = vpack.c.bf16 %v480_v39, %v479_v38  ;;  %p2360_p1 = pnand %p2359_p10, %p2353_p6 }
  0xc1   : > { %1903 = vmatprep.subr.bf16.mxu0 %v2067_v7  ;;  %1865 = vmatprep.mubr.bf16.mxu1 %v541_v22  ;;  %v388_v44 = vld [vmem:[%s2740_s7 + $0x38] sm:$0xff]  ;;  %v419_v47 = vld [vmem:[%s2746_s18 + $0x30] sm:$0xff]  ;;  %v389_v49 = vld [vmem:[%s2740_s7 + $0x40] sm:$0xff]  ;;  %v511_v50 = vpack.c.bf16 %v482_v41, %v481_v40 }
  0xc2   : > { %v543_v46 = vpack.c.bf16 %v450_v37, %v449_v36  ;;  %v420_v48 = vld [vmem:[%s2746_s18 + $0x38] sm:$0xff]  ;;  %v390_v51 = vld [vmem:[%s2740_s7 + $0x48] sm:$0xff]  ;;  %v421_v52 = vld [vmem:[%s2746_s18 + $0x40] sm:$0xff]  ;;  %v451_v54 = vadd.f32 %v419_v47, %v387_v43 }
  0xc3   : > { %1856 = vmatpush3.bf16.msra.mxu1 %v2066_v6  ;;  %v422_v53 = vld [vmem:[%s2746_s18 + $0x48] sm:$0xff]  ;;  %v452_v55 = vadd.f32 %v420_v48, %v388_v44  ;;  %v453_v56 = vadd.f32 %v421_v52, %v389_v49  ;;  %v483_v58 = vld [vmem:[%s2733_s13 + $0x30] sm:$0xff]  ;;  %v484_v59 = vld [vmem:[%s2733_s13 + $0x38] sm:$0xff] }
  0xc4   : > { %1904 = vmatpush3.bf16.msra.mxu0 %v2067_v7  ;;  %1857 = vmatprep.subr.bf16.mxu1 %v2068_v8  ;;  %v454_v57 = vadd.f32 %v422_v53, %v390_v51  ;;  %v485_v60 = vld [vmem:[%s2733_s13 + $0x40] sm:$0xff]  ;;  %v486_v61 = vld [vmem:[%s2733_s13 + $0x48] sm:$0xff]  ;;  %v391_v63 = vld [vmem:[%s2740_s7 + $0x50] sm:$0xff]  ;;  %v512_v1 = vpack.c.bf16 %v484_v59, %v483_v58 }
  0xc5   : > { %1905 = vmatprep.subr.bf16.mxu0 %v2069_v9  ;;  %v544_v62 = vpack.c.bf16 %v452_v55, %v451_v54  ;;  %v392_v0 = vld [vmem:[%s2740_s7 + $0x58] sm:$0xff]  ;;  %v423_v3 = vld [vmem:[%s2746_s18 + $0x50] sm:$0xff]  ;;  %v393_v5 = vld [vmem:[%s2740_s7 + $0x60] sm:$0xff]  ;;  %v513_v6 = vpack.c.bf16 %v486_v61, %v485_v60 }
  0xc6   : > { %v545_v2 = vpack.c.bf16 %v454_v57, %v453_v56  ;;  %v424_v4 = vld [vmem:[%s2746_s18 + $0x58] sm:$0xff]  ;;  %v394_v7 = vld [vmem:[%s2740_s7 + $0x68] sm:$0xff]  ;;  %v487_v14 = vld [vmem:[%s2733_s13 + $0x50] sm:$0xff] }
  0xc7   : > { %1858 = vmatpush3.bf16.msra.mxu1 %v2068_v8  ;;  %v425_v8 = vld [vmem:[%s2746_s18 + $0x60] sm:$0xff]  ;;  %v488_v15 = vld [vmem:[%s2733_s13 + $0x58] sm:$0xff]  ;;  %v490_v17 = vld [vmem:[%s2733_s13 + $0x68] sm:$0xff] }
  0xc8   : > { %1906 = vmatpush3.bf16.msra.mxu0 %v2069_v9  ;;  %1859 = vmatprep.subr.bf16.mxu1 %v2070_v10  ;;  %v426_v9 = vld [vmem:[%s2746_s18 + $0x68] sm:$0xff]  ;;  %v457_v12 = vadd.f32 %v425_v8, %v393_v5  ;;  %v489_v16 = vld [vmem:[%s2733_s13 + $0x60] sm:$0xff]  ;;  %v395_v19 = vld [vmem:[%s2740_s7 + $0x70] sm:$0xff] }
  0xc9   : > { %1907 = vmatprep.subr.bf16.mxu0 %v2071_v11  ;;  %v458_v13 = vadd.f32 %v426_v9, %v394_v7  ;;  %v396_v20 = vld [vmem:[%s2740_s7 + $0x78] sm:$0xff]  ;;  %v397_v25 = vld [vmem:[%s2740_s7 + $0x80] sm:$0xff]  ;;  %v515_v26 = vpack.c.bf16 %v490_v17, %v489_v16  ;;  %v398_v27 = vld [vmem:[%s2740_s7 + $0x88] sm:$0xff] }
  0xca   : > { %v429_v28 = vld [vmem:[%s2746_s18 + $0x80] sm:$0xff]  ;;  %v430_v29 = vld [vmem:[%s2746_s18 + $0x88] sm:$0xff]  ;;  %v491_v34 = vld [vmem:[%s2733_s13 + $0x70] sm:$0xff] }
  0xcb   : > { %1860 = vmatpush3.bf16.msra.mxu1 %v2070_v10  ;;  %v455_v10 = vadd.f32 %v423_v3, %v391_v63  ;;  %v547_v22 = vpack.c.bf16 %v458_v13, %v457_v12  ;;  %v461_v32 = vadd.f32 %v429_v28, %v397_v25  ;;  %v492_v35 = vld [vmem:[%s2733_s13 + $0x78] sm:$0xff]  ;;  %v493_v36 = vld [vmem:[%s2733_s13 + $0x80] sm:$0xff]  ;;  %v494_v37 = vld [vmem:[%s2733_s13 + $0x88] sm:$0xff] }
  0xcc   : > { %1908 = vmatpush3.bf16.msra.mxu0 %v2071_v11  ;;  %1861 = vmatprep.subr.bf16.mxu1 %v2072_v21  ;;  %v456_v11 = vadd.f32 %v424_v4, %v392_v0  ;;  %v399_v39 = vld [vmem:[%s2740_s7 + $0x90] sm:$0xff]  ;;  %v400_v40 = vld [vmem:[%s2740_s7 + $0x98] sm:$0xff]  ;;  %v516_v41 = vpack.c.bf16 %v492_v35, %v491_v34  ;;  %v402_v47 = vld [vmem:[%s2740_s7 + $0xa8] sm:$0xff] }
  0xcd   : > { %1909 = vmatprep.subr.bf16.mxu0 %v2073_v23  ;;  %v431_v43 = vld [vmem:[%s2746_s18 + $0x90] sm:$0xff]  ;;  %v432_v44 = vld [vmem:[%s2746_s18 + $0x98] sm:$0xff]  ;;  %v433_v48 = vld [vmem:[%s2746_s18 + $0xa0] sm:$0xff] }
  0xce   : > { %v546_v18 = vpack.c.bf16 %v456_v11, %v455_v10  ;;  %v434_v49 = vld [vmem:[%s2746_s18 + $0xa8] sm:$0xff]  ;;  %v464_v51 = vadd.f32 %v432_v44, %v400_v40  ;;  %v495_v54 = vld [vmem:[%s2733_s13 + $0x90] sm:$0xff]  ;;  %v496_v55 = vld [vmem:[%s2733_s13 + $0x98] sm:$0xff] }
  0xcf   : > { %1862 = vmatpush3.bf16.msra.mxu1 %v2072_v21  ;;  %v514_v21 = vpack.c.bf16 %v488_v15, %v487_v14  ;;  %v466_v53 = vadd.f32 %v434_v49, %v402_v47  ;;  %v497_v56 = vld [vmem:[%s2733_s13 + $0xa0] sm:$0xff]  ;;  %v498_v57 = vld [vmem:[%s2733_s13 + $0xa8] sm:$0xff]  ;;  %v403_v59 = vld [vmem:[%s2740_s7 + $0xb0] sm:$0xff]  ;;  %v518_v61 = vpack.c.bf16 %v496_v55, %v495_v54 }
  0xd0   : > { %1910 = vmatpush3.bf16.msra.mxu0 %v2073_v23  ;;  %1863 = vmatprep.subr.bf16.mxu1 %v2074_v24  ;;  %v427_v23 = vld [vmem:[%s2746_s18 + $0x70] sm:$0xff]  ;;  %v404_v60 = vld [vmem:[%s2740_s7 + $0xb8] sm:$0xff]  ;;  %v406_v3 = vld [vmem:[%s2740_s7 + $0xc8] sm:$0xff] }
  0xd1   : > { %1911 = vmatprep.subr.bf16.mxu0 %v2075_v33  ;;  %v459_v30 = vadd.f32 %v427_v23, %v395_v19  ;;  %v435_v63 = vld [vmem:[%s2746_s18 + $0xb0] sm:$0xff]  ;;  %v436_v0 = vld [vmem:[%s2746_s18 + $0xb8] sm:$0xff]  ;;  %v437_v4 = vld [vmem:[%s2746_s18 + $0xc0] sm:$0xff] }
  0xd2   : > { %v438_v5 = vld [vmem:[%s2746_s18 + $0xc8] sm:$0xff]  ;;  %v468_v7 = vadd.f32 %v436_v0, %v404_v60  ;;  %v499_v10 = vld [vmem:[%s2733_s13 + $0xb0] sm:$0xff]  ;;  %v500_v11 = vld [vmem:[%s2733_s13 + $0xb8] sm:$0xff] }
  0xd3   : > { %1864 = vmatpush3.bf16.msra.mxu1 %v2074_v24  ;;  %v428_v24 = vld [vmem:[%s2746_s18 + $0x78] sm:$0xff]  ;;  %v470_v9 = vadd.f32 %v438_v5, %v406_v3  ;;  %v501_v12 = vld [vmem:[%s2733_s13 + $0xc0] sm:$0xff]  ;;  %v502_v13 = vld [vmem:[%s2733_s13 + $0xc8] sm:$0xff]  ;;  %v520_v17 = vpack.c.bf16 %v500_v11, %v499_v10 }
  0xd4   : > { %1912 = vmatpush3.bf16.msra.mxu0 %v2075_v33  ;;  %v460_v31 = vadd.f32 %v428_v24, %v396_v20  ;;  %v462_v33 = vadd.f32 %v430_v29, %v398_v27  ;;  %v407_v15 = vld [vmem:[%s2740_s7 + $0xd0] sm:$0xff]  ;;  %v408_v16 = vld [vmem:[%s2740_s7 + $0xd8] sm:$0xff]  ;;  %v410_v23 = vld [vmem:[%s2740_s7 + $0xe8] sm:$0xff] }
  0xd5   : > { %v439_v19 = vld [vmem:[%s2746_s18 + $0xd0] sm:$0xff]  ;;  %v440_v20 = vld [vmem:[%s2746_s18 + $0xd8] sm:$0xff]  ;;  %v441_v24 = vld [vmem:[%s2746_s18 + $0xe0] sm:$0xff] }
  0xd6   : > { %1866 = vmatmul.mubr.bf16.vlgmr.msra.gmra.mrb[0].mxu1 %v542_v42  ;;  %v548_v38 = vpack.c.bf16 %v460_v31, %v459_v30  ;;  %v549_v42 = vpack.c.bf16 %v462_v33, %v461_v32  ;;  %v442_v25 = vld [vmem:[%s2746_s18 + $0xe8] sm:$0xff]  ;;  %v472_v27 = vadd.f32 %v440_v20, %v408_v16  ;;  %v503_v30 = vld [vmem:[%s2733_s13 + $0xd0] sm:$0xff]  ;;  %v504_v31 = vld [vmem:[%s2733_s13 + $0xd8] sm:$0xff] }
  0xd7   : > { %1914 = vmatmul.mubr.bf16.vlgmr.msra.gmra.mrb[0].mxu0 %v510_v45  ;;  %1869 = vmatprep.mubr.bf16.mxu1 %v543_v46  ;;  %v401_v45 = vld [vmem:[%s2740_s7 + $0xa0] sm:$0xff]  ;;  %v517_v46 = vpack.c.bf16 %v494_v37, %v493_v36  ;;  %v474_v29 = vadd.f32 %v442_v25, %v410_v23  ;;  %v506_v33 = vld [vmem:[%s2733_s13 + $0xe8] sm:$0xff]  ;;  %v411_v35 = vld [vmem:[%s2740_s7 + $0xf0] sm:$0xff]  ;;  %v522_v36 = vpack.c.bf16 %v504_v31, %v503_v30 }
  0xd8   : > { %1917 = vmatprep.mubr.bf16.mxu0 %v511_v50  ;;  %v463_v50 = vadd.f32 %v431_v43, %v399_v39  ;;  %v465_v52 = vadd.f32 %v433_v48, %v401_v45  ;;  %v505_v32 = vld [vmem:[%s2733_s13 + $0xe0] sm:$0xff]  ;;  %v443_v39 = vld [vmem:[%s2746_s18 + $0xf0] sm:$0xff]  ;;  %v444_v40 = vld [vmem:[%s2746_s18 + $0xf8] sm:$0xff] }
  0xd9   : > { %v507_v44 = vld [vmem:[%s2733_s13 + $0xf0] sm:$0xff]  ;;  %v508_v45 = vld [vmem:[%s2733_s13 + $0xf8] sm:$0xff] }
  0xda   : > { %v550_v58 = vpack.c.bf16 %v464_v51, %v463_v50  ;;  %v524_v47 = vpack.c.bf16 %v508_v45, %v507_v44  ;;  %v2851_v50 = vld [vmem:[%s3090_s5] ss:$0 sm:$0xff] }
  0xde   : > { %1870 = vmatmul.mubr.bf16.gmra.mrb[4].mxu1 %v544_v62  ;;  %v551_v62 = vpack.c.bf16 %v466_v53, %v465_v52 }
  0xdf   : > { %1918 = vmatmul.mubr.bf16.gmra.mrb[4].mxu0 %v512_v1  ;;  %1873 = vmatprep.mubr.bf16.mxu1 %v545_v2  ;;  %v405_v1 = vld [vmem:[%s2740_s7 + $0xc0] sm:$0xff]  ;;  %v519_v2 = vpack.c.bf16 %v498_v57, %v497_v56 }
  0xe0   : > { %1921 = vmatprep.mubr.bf16.mxu0 %v513_v6  ;;  %v467_v6 = vadd.f32 %v435_v63, %v403_v59  ;;  %v469_v8 = vadd.f32 %v437_v4, %v405_v1 }
  0xe2   : > { %v552_v14 = vpack.c.bf16 %v468_v7, %v467_v6 }
  0xe6   : > { %1874 = vmatmul.mubr.bf16.gmra.mrb[8].mxu1 %v546_v18  ;;  %v553_v18 = vpack.c.bf16 %v470_v9, %v469_v8 }
  0xe7   : > { %1922 = vmatmul.mubr.bf16.gmra.mrb[8].mxu0 %v514_v21  ;;  %1877 = vmatprep.mubr.bf16.mxu1 %v547_v22  ;;  %v409_v21 = vld [vmem:[%s2740_s7 + $0xe0] sm:$0xff]  ;;  %v521_v22 = vpack.c.bf16 %v502_v13, %v501_v12 }
  0xe8   : > { %1925 = vmatprep.mubr.bf16.mxu0 %v515_v26  ;;  %v471_v26 = vadd.f32 %v439_v19, %v407_v15  ;;  %v473_v28 = vadd.f32 %v441_v24, %v409_v21 }
  0xea   : > { %v554_v34 = vpack.c.bf16 %v472_v27, %v471_v26  ;;  %v555_v37 = vpack.c.bf16 %v474_v29, %v473_v28 }
  0xee   : > { %1878 = vmatmul.mubr.bf16.gmra.mrb[12].mxu1 %v548_v38  ;;  %v412_v38 = vld [vmem:[%s2740_s7 + $0xf8] sm:$0xff] }
  0xef   : > { %1926 = vmatmul.mubr.bf16.gmra.mrb[12].mxu0 %v516_v41  ;;  %1881 = vmatprep.mubr.bf16.mxu1 %v549_v42  ;;  %v523_v41 = vpack.c.bf16 %v506_v33, %v505_v32  ;;  %v475_v42 = vadd.f32 %v443_v39, %v411_v35  ;;  %v476_v43 = vadd.f32 %v444_v40, %v412_v38 }
  0xf0   : > { %1929 = vmatprep.mubr.bf16.mxu0 %v517_v46 }
  0xf1   : > { %v556_v46 = vpack.c.bf16 %v476_v43, %v475_v42 }
  0xf6   : > { %1882 = vmatmul.mubr.bf16.gmra.mrb[16].mxu1 %v550_v58 }
  0xf7   : > { %1930 = vmatmul.mubr.bf16.gmra.mrb[16].mxu0 %v518_v61  ;;  %1885 = vmatprep.mubr.bf16.mxu1 %v551_v62 }
  0xf8   : > { %1933 = vmatprep.mubr.bf16.mxu0 %v519_v2 }
  0xfe   : > { %1886 = vmatmul.mubr.bf16.gmra.mrb[20].mxu1 %v552_v14 }
  0xff   : > { %1934 = vmatmul.mubr.bf16.gmra.mrb[20].mxu0 %v520_v17  ;;  %1889 = vmatprep.mubr.bf16.mxu1 %v553_v18 }
 0x100   : > { %1937 = vmatprep.mubr.bf16.mxu0 %v521_v22 }
 0x106   : > { %1890 = vmatmul.mubr.bf16.gmra.mrb[24].mxu1 %v554_v34 }
 0x107   : > { %1938 = vmatmul.mubr.bf16.gmra.mrb[24].mxu0 %v522_v36  ;;  %1893 = vmatprep.mubr.bf16.mxu1 %v555_v37 }
 0x108   : > { %1941 = vmatprep.mubr.bf16.mxu0 %v523_v41 }
 0x10e   : > { %1894 = vmatmul.mubr.bf16.gmra.mrb[28].mxu1 %v556_v46 }
 0x10f   : > { %1942 = vmatmul.mubr.bf16.gmra.mrb[28].mxu0 %v524_v47 }
 0x1a9   : > { %v1867_v48 = vpop.f32.mrb[0].mxu1 }
 0x1aa   : > { %v1915_v49 = vpop.f32.mrb[0].mxu0  ;;  %v655_v51 = vpop.f32.mrb[1].mxu1 }
 0x1ab   : > { %v873_v52 = vadd.f32 %v1915_v49, %v1867_v48  ;;  %v864_v53 = vpop.f32.mrb[1].mxu0  ;;  %v1868_v54 = vpop.f32.mrb[2].mxu1 }
 0x1ac   : > { %v865_v55 = vadd.f32 %v864_v53, %v655_v51  ;;  %v1916_v56 = vpop.f32.mrb[2].mxu0  ;;  %v658_v57 = vpop.f32.mrb[3].mxu1 }
 0x1ad   : > { %v2854_v58 = vadd.f32 %v2851_v50, %v873_v52  ;;  %v876_v59 = vadd.f32 %v1916_v56, %v1868_v54  ;;  %v867_v60 = vpop.f32.mrb[3].mxu0 }
 0x1ae   : > { %v2857_v61 = vadd.f32 %v2851_v50, %v865_v55  ;;  %v868_v62 = vadd.f32 %v867_v60, %v658_v57 }
 0x1af   : > { %v1603_v63 = vmul.f32 -1.442695, %v2854_v58  ;;  %v2861_v0 = vadd.f32 %v2851_v50, %v876_v59 }
 0x1b0   : > { %v1601_v1 = vmul.f32 -1.442695, %v2857_v61  ;;  %v2865_v2 = vadd.f32 %v2851_v50, %v868_v62 }
 0x1b1   : > { %2076 = vpow2.f32 %v1603_v63  ;;  %v1604_v3 = vmul.f32 -1.442695, %v2861_v0  ;;  %v1871_v4 = vpop.f32.mrb[4].mxu1 }
 0x1b2   : > { %2078 = vpow2.f32 %v1601_v1  ;;  %v1602_v5 = vmul.f32 -1.442695, %v2865_v2  ;;  %v1919_v6 = vpop.f32.mrb[4].mxu0  ;;  %v671_v7 = vpop.f32.mrb[5].mxu1 }
 0x1b3   : > { %2080 = vpow2.f32 %v1604_v3  ;;  %v889_v8 = vadd.f32 %v1919_v6, %v1871_v4  ;;  %v880_v9 = vpop.f32.mrb[5].mxu0  ;;  %v1872_v10 = vpop.f32.mrb[6].mxu1 }
 0x1b4   : > { %2082 = vpow2.f32 %v1602_v5  ;;  %v881_v11 = vadd.f32 %v880_v9, %v671_v7  ;;  %v1920_v12 = vpop.f32.mrb[6].mxu0  ;;  %v674_v13 = vpop.f32.mrb[7].mxu1 }
 0x1b5   : > { %v2870_v14 = vadd.f32 %v2851_v50, %v889_v8  ;;  %v892_v15 = vadd.f32 %v1920_v12, %v1872_v10  ;;  %v883_v16 = vpop.f32.mrb[7].mxu0 }
 0x1b6   : > { %v2873_v17 = vadd.f32 %v2851_v50, %v881_v11  ;;  %v884_v18 = vadd.f32 %v883_v16, %v674_v13 }
 0x1b7   : > { %v1607_v19 = vmul.f32 -1.442695, %v2870_v14  ;;  %v2877_v20 = vadd.f32 %v2851_v50, %v892_v15 }
 0x1b8   : > { %v1605_v21 = vmul.f32 -1.442695, %v2873_v17  ;;  %v2881_v22 = vadd.f32 %v2851_v50, %v884_v18 }
 0x1b9   : > { %2084 = vpow2.f32 %v1607_v19  ;;  %v1608_v23 = vmul.f32 -1.442695, %v2877_v20  ;;  %v1875_v24 = vpop.f32.mrb[8].mxu1 }
 0x1ba   : > { %2086 = vpow2.f32 %v1605_v21  ;;  %v1606_v25 = vmul.f32 -1.442695, %v2881_v22  ;;  %v1923_v26 = vpop.f32.mrb[8].mxu0  ;;  %v687_v27 = vpop.f32.mrb[9].mxu1 }
 0x1bb   : > { %v2077_v28 = vpop.eup %2076  ;;  %2088 = vpow2.f32 %v1608_v23  ;;  %v905_v29 = vadd.f32 %v1923_v26, %v1875_v24  ;;  %v896_v30 = vpop.f32.mrb[9].mxu0 }
 0x1bc   : > { %v1876_v31 = vpop.f32.mrb[10].mxu1  ;;  %v2079_v32 = vpop.eup %2078  ;;  %v1128_v33 = vadd.f32 1.0, %v2077_v28  ;;  %2090 = vpow2.f32 %v1606_v25  ;;  %v897_v34 = vadd.f32 %v896_v30, %v687_v27 }
 0x1bd   : > { %v1924_v35 = vpop.f32.mrb[10].mxu0  ;;  %v690_v36 = vpop.f32.mrb[11].mxu1  ;;  %v1126_v38 = vadd.f32 1.0, %v2079_v32  ;;  %v2886_v39 = vadd.f32 %v2851_v50, %v905_v29 }
 0x1be   : > { %v2081_v37 = vpop.eup %2080  ;;  %v908_v40 = vadd.f32 %v1924_v35, %v1876_v31  ;;  %v899_v41 = vpop.f32.mrb[11].mxu0  ;;  %2092 = vrcp.f32 %v1128_v33  ;;  %v2889_v44 = vadd.f32 %v2851_v50, %v897_v34 }
 0x1bf   : > { %v2083_v42 = vpop.eup %2082  ;;  %v1129_v43 = vadd.f32 1.0, %v2081_v37  ;;  %v900_v45 = vadd.f32 %v899_v41, %v690_v36  ;;  %2094 = vrcp.f32 %v1126_v38  ;;  %v1611_v47 = vmul.f32 -1.442695, %v2886_v39 }
 0x1c0   : > { %v1127_v46 = vadd.f32 1.0, %v2083_v42  ;;  %v2893_v48 = vadd.f32 %v2851_v50, %v908_v40  ;;  %v1609_v49 = vmul.f32 -1.442695, %v2889_v44 }
 0x1c1   : > { %2096 = vrcp.f32 %v1129_v43  ;;  %v2897_v51 = vadd.f32 %v2851_v50, %v900_v45  ;;  %v1879_v53 = vpop.f32.mrb[12].mxu1 }
 0x1c2   : > { %2098 = vrcp.f32 %v1127_v46  ;;  %v1612_v52 = vmul.f32 -1.442695, %v2893_v48  ;;  %v1927_v55 = vpop.f32.mrb[12].mxu0  ;;  %v703_v56 = vpop.f32.mrb[13].mxu1 }
 0x1c3   : > { %2100 = vpow2.f32 %v1611_v47  ;;  %v1610_v54 = vmul.f32 -1.442695, %v2897_v51  ;;  %v2085_v57 = vpop.eup %2084  ;;  %v921_v59 = vadd.f32 %v1927_v55, %v1879_v53  ;;  %v912_v60 = vpop.f32.mrb[13].mxu0 }
 0x1c4   : > { %2102 = vpow2.f32 %v1609_v49  ;;  %v1880_v62 = vpop.f32.mrb[14].mxu1  ;;  %v2087_v63 = vpop.eup %2086  ;;  %v1132_v1 = vadd.f32 1.0, %v2085_v57  ;;  %v913_v3 = vadd.f32 %v912_v60, %v703_v56 }
 0x1c5   : > { %2104 = vpow2.f32 %v1612_v52  ;;  %v1928_v4 = vpop.f32.mrb[14].mxu0  ;;  %v706_v5 = vpop.f32.mrb[15].mxu1  ;;  %v1130_v7 = vadd.f32 1.0, %v2087_v63  ;;  %v2902_v8 = vadd.f32 %v2851_v50, %v921_v59 }
 0x1c6   : > { %v2089_v6 = vpop.eup %2088  ;;  %2106 = vpow2.f32 %v1610_v54  ;;  %v924_v9 = vadd.f32 %v1928_v4, %v1880_v62  ;;  %v915_v10 = vpop.f32.mrb[15].mxu0  ;;  %v2905_v13 = vadd.f32 %v2851_v50, %v913_v3 }
 0x1c7   : > { %v2091_v11 = vpop.eup %2090  ;;  %2108 = vrcp.f32 %v1132_v1  ;;  %v1133_v12 = vadd.f32 1.0, %v2089_v6  ;;  %v916_v15 = vadd.f32 %v915_v10, %v706_v5  ;;  %v1615_v18 = vmul.f32 -1.442695, %v2902_v8 }
 0x1c8   : > { %2110 = vrcp.f32 %v1130_v7  ;;  %v1131_v16 = vadd.f32 1.0, %v2091_v11  ;;  %v2909_v19 = vadd.f32 %v2851_v50, %v924_v9  ;;  %v2093_v21 = vpop.eup %2092  ;;  %v1613_v23 = vmul.f32 -1.442695, %v2905_v13 }
 0x1c9   : > { %2112 = vrcp.f32 %v1133_v12  ;;  %v2913_v24 = vadd.f32 %v2851_v50, %v916_v15  ;;  %v2095_v25 = vpop.eup %2094  ;;  %v1883_v27 = vpop.f32.mrb[16].mxu1  ;;  %v1224_v33 = vmul.f32 %v2093_v21, %v2854_v58 }
 0x1ca   : > { %2114 = vrcp.f32 %v1131_v16  ;;  %v1616_v26 = vmul.f32 -1.442695, %v2909_v19  ;;  %v1931_v30 = vpop.f32.mrb[16].mxu0  ;;  %v719_v31 = vpop.f32.mrb[17].mxu1  ;;  %v1222_v40 = vmul.f32 %v2095_v25, %v2857_v61 }
 0x1cb   : > { %v2097_v28 = vpop.eup %2096  ;;  %2116 = vpow2.f32 %v1615_v18  ;;  %v1614_v29 = vmul.f32 -1.442695, %v2913_v24  ;;  %v937_v35 = vadd.f32 %v1931_v30, %v1883_v27  ;;  %v928_v36 = vpop.f32.mrb[17].mxu0 }
 0x1cc   : > { %v2099_v32 = vpop.eup %2098  ;;  %v1225_v34 = vmul.f32 %v2097_v28, %v2861_v0  ;;  %2118 = vpow2.f32 %v1613_v23  ;;  %v1884_v37 = vpop.f32.mrb[18].mxu1  ;;  %v929_v42 = vadd.f32 %v928_v36, %v719_v31 }
 0x1cd   : > { %v2101_v38 = vpop.eup %2100  ;;  %v1223_v41 = vmul.f32 %v2099_v32, %v2865_v2  ;;  %2120 = vpow2.f32 %v1616_v26  ;;  %v1932_v43 = vpop.f32.mrb[18].mxu0  ;;  %v2923_v58 = vadd.f32 %v2851_v50, %v937_v35 }
 0x1ce   : > { %v722_v45 = vpop.f32.mrb[19].mxu1  ;;  %v2103_v46 = vpop.eup %2102  ;;  %v1714_v47 = vpack.c.bf16 %v1225_v34, %v1224_v33  ;;  %v1136_v49 = vadd.f32 1.0, %v2101_v38  ;;  %2122 = vpow2.f32 %v1614_v29  ;;  %v2926_v61 = vadd.f32 %v2851_v50, %v929_v42 }
 0x1cf   : > { %v931_v0 = vpop.f32.mrb[19].mxu0  ;;  %v2105_v52 = vpop.eup %2104  ;;  %v1709_v53 = vpack.c.bf16 %v1223_v41, %v1222_v40  ;;  %v1134_v54 = vadd.f32 1.0, %v2103_v46  ;;  %v940_v2 = vadd.f32 %v1932_v43, %v1884_v37  ;;  %v1619_v57 = vmul.f32 -1.442695, %v2923_v58 }
 0x1d0   : > { %v2107_v55 = vpop.eup %2106  ;;  %1786 = vst [vmem:[%s2930_s19 + $0x8] sm:$0xff] %v1714_v47   ;;  %2124 = vrcp.f32 %v1136_v49  ;;  %v1137_v56 = vadd.f32 1.0, %v2105_v52  ;;  %v932_v59 = vadd.f32 %v931_v0, %v722_v45  ;;  %v1617_v63 = vmul.f32 -1.442695, %v2926_v61 }
 0x1d1   : > { %v2109_v60 = vpop.eup %2108  ;;  %1710 = vst [vmem:[%s2930_s19] sm:$0xff] %v1709_v53   ;;  %2126 = vrcp.f32 %v1134_v54  ;;  %v1135_v62 = vadd.f32 1.0, %v2107_v55  ;;  %v2937_v1 = vadd.f32 %v2851_v50, %v940_v2  ;;  %v1887_v5 = vpop.f32.mrb[20].mxu1 }
 0x1d2   : > { %v2111_v3 = vpop.eup %2110  ;;  %2128 = vrcp.f32 %v1137_v56  ;;  %v2940_v4 = vadd.f32 %v2851_v50, %v932_v59  ;;  %v1228_v7 = vmul.f32 %v2109_v60, %v2870_v14  ;;  %v1935_v10 = vpop.f32.mrb[20].mxu0 }
 0x1d3   : > { %v2113_v6 = vpop.eup %2112  ;;  %2130 = vrcp.f32 %v1135_v62  ;;  %v1620_v9 = vmul.f32 -1.442695, %v2937_v1  ;;  %v735_v11 = vpop.f32.mrb[21].mxu1  ;;  %v953_v18 = vadd.f32 %v1935_v10, %v1887_v5  ;;  %v1226_v26 = vmul.f32 %v2111_v3, %v2873_v17 }
 0x1d4   : > { %v2115_v12 = vpop.eup %2114  ;;  %v1229_v15 = vmul.f32 %v2113_v6, %v2877_v20  ;;  %2132 = vpow2.f32 %v1619_v57  ;;  %v1618_v16 = vmul.f32 -1.442695, %v2940_v4  ;;  %v944_v21 = vpop.f32.mrb[21].mxu0 }
 0x1d5   : > { %v1888_v23 = vpop.f32.mrb[22].mxu1  ;;  %v2117_v25 = vpop.eup %2116  ;;  %v1227_v27 = vmul.f32 %v2115_v12, %v2881_v22  ;;  %2134 = vpow2.f32 %v1617_v63  ;;  %v945_v14 = vadd.f32 %v944_v21, %v735_v11  ;;  %v2949_v32 = vadd.f32 %v2851_v50, %v953_v18 }
 0x1d6   : > { %v1936_v28 = vpop.f32.mrb[22].mxu0  ;;  %v738_v29 = vpop.f32.mrb[23].mxu1  ;;  %v1724_v31 = vpack.c.bf16 %v1229_v15, %v1228_v7  ;;  %v1140_v20 = vadd.f32 1.0, %v2117_v25  ;;  %2136 = vpow2.f32 %v1620_v9 }
 0x1d7   : > { %v2119_v30 = vpop.eup %2118  ;;  %v947_v33 = vpop.f32.mrb[23].mxu0  ;;  %v1719_v35 = vpack.c.bf16 %v1227_v27, %v1226_v26  ;;  %2138 = vpow2.f32 %v1618_v16  ;;  %v2952_v17 = vadd.f32 %v2851_v50, %v945_v14  ;;  %v1623_v38 = vmul.f32 -1.442695, %v2949_v32 }
 0x1d8   : > { %v2121_v34 = vpop.eup %2120  ;;  %v1138_v36 = vadd.f32 1.0, %v2119_v30  ;;  %1788 = vst [vmem:[%s2930_s19 + $0x18] sm:$0xff] %v1724_v31   ;;  %2140 = vrcp.f32 %v1140_v20  ;;  %v956_v40 = vadd.f32 %v1936_v28, %v1888_v23  ;;  %v948_v43 = vadd.f32 %v947_v33, %v738_v29 }
 0x1d9   : > { %v2123_v22 = vpop.eup %2122  ;;  %v1141_v37 = vadd.f32 1.0, %v2121_v34  ;;  %1787 = vst [vmem:[%s2930_s19 + $0x10] sm:$0xff] %v1719_v35   ;;  %v1621_v42 = vmul.f32 -1.442695, %v2952_v17  ;;  %v1891_v47 = vpop.f32.mrb[24].mxu1 }
 0x1da   : > { %2142 = vrcp.f32 %v1138_v36  ;;  %v1139_v41 = vadd.f32 1.0, %v2123_v22  ;;  %v2125_v45 = vpop.eup %2124  ;;  %v2959_v46 = vadd.f32 %v2851_v50, %v956_v40  ;;  %v2963_v52 = vadd.f32 %v2851_v50, %v948_v43  ;;  %v1939_v53 = vpop.f32.mrb[24].mxu0 }
 0x1db   : > { %2144 = vrcp.f32 %v1141_v37  ;;  %v2127_v49 = vpop.eup %2126  ;;  %v1232_v0 = vmul.f32 %v2125_v45, %v2886_v39  ;;  %v751_v54 = vpop.f32.mrb[25].mxu1  ;;  %v969_v57 = vadd.f32 %v1939_v53, %v1891_v47 }
 0x1dc   : > { %2146 = vrcp.f32 %v1139_v41  ;;  %v2129_v2 = vpop.eup %2128  ;;  %v1230_v55 = vmul.f32 %v2127_v49, %v2889_v44  ;;  %v1624_v56 = vmul.f32 -1.442695, %v2959_v46  ;;  %v960_v59 = vpop.f32.mrb[25].mxu0  ;;  %v1622_v39 = vmul.f32 -1.442695, %v2963_v52 }
 0x1dd   : > { %2148 = vpow2.f32 %v1623_v38  ;;  %v1892_v60 = vpop.f32.mrb[26].mxu1  ;;  %v2131_v62 = vpop.eup %2130  ;;  %v1233_v63 = vmul.f32 %v2129_v2, %v2893_v48  ;;  %v961_v3 = vadd.f32 %v960_v59, %v751_v54  ;;  %v2971_v44 = vadd.f32 %v2851_v50, %v969_v57 }
 0x1de   : > { %2150 = vpow2.f32 %v1621_v42  ;;  %v1940_v5 = vpop.f32.mrb[26].mxu0  ;;  %v754_v6 = vpop.f32.mrb[27].mxu1  ;;  %v1231_v9 = vmul.f32 %v2131_v62, %v2897_v51 }
 0x1df   : > { %v2133_v7 = vpop.eup %2132  ;;  %2152 = vpow2.f32 %v1624_v56  ;;  %v972_v10 = vadd.f32 %v1940_v5, %v1892_v60  ;;  %v963_v11 = vpop.f32.mrb[27].mxu0  ;;  %v1734_v15 = vpack.c.bf16 %v1233_v63, %v1232_v0  ;;  %v2974_v16 = vadd.f32 %v2851_v50, %v961_v3 }
 0x1e0   : > { %v2135_v12 = vpop.eup %2134  ;;  %v1144_v48 = vadd.f32 1.0, %v2133_v7  ;;  %2154 = vpow2.f32 %v1622_v39  ;;  %v1729_v21 = vpack.c.bf16 %v1231_v9, %v1230_v55  ;;  %v1627_v27 = vmul.f32 -1.442695, %v2971_v44 }
 0x1e1   : > { %v2137_v18 = vpop.eup %2136  ;;  %v1142_v23 = vadd.f32 1.0, %v2135_v12  ;;  %v2977_v25 = vadd.f32 %v2851_v50, %v972_v10  ;;  %1790 = vst [vmem:[%s2930_s19 + $0x28] sm:$0xff] %v1734_v15   ;;  %v964_v14 = vadd.f32 %v963_v11, %v754_v6  ;;  %v1625_v30 = vmul.f32 -1.442695, %v2974_v16  ;;  %v1895_v31 = vpop.f32.mrb[28].mxu1 }
 0x1e2   : > { %v2139_v51 = vpop.eup %2138  ;;  %2156 = vrcp.f32 %v1144_v48  ;;  %v1145_v26 = vadd.f32 1.0, %v2137_v18  ;;  %1789 = vst [vmem:[%s2930_s19 + $0x20] sm:$0xff] %v1729_v21   ;;  %v1943_v35 = vpop.f32.mrb[28].mxu0 }
 0x1e3   : > { %v2141_v28 = vpop.eup %2140  ;;  %2158 = vrcp.f32 %v1142_v23  ;;  %v1143_v29 = vadd.f32 1.0, %v2139_v51  ;;  %v1628_v33 = vmul.f32 -1.442695, %v2977_v25  ;;  %v2985_v34 = vadd.f32 %v2851_v50, %v964_v14  ;;  %v767_v36 = vpop.f32.mrb[29].mxu1 }
 0x1e4   : > { %v2143_v20 = vpop.eup %2142  ;;  %2160 = vrcp.f32 %v1145_v26  ;;  %v1236_v37 = vmul.f32 %v2141_v28, %v2902_v8  ;;  %v985_v40 = vadd.f32 %v1943_v35, %v1895_v31  ;;  %v976_v41 = vpop.f32.mrb[29].mxu0 }
 0x1e5   : > { %v2145_v22 = vpop.eup %2144  ;;  %v1234_v38 = vmul.f32 %v2143_v20, %v2905_v13  ;;  %2162 = vrcp.f32 %v1143_v29  ;;  %v1896_v42 = vpop.f32.mrb[30].mxu1  ;;  %v1626_v47 = vmul.f32 -1.442695, %v2985_v34  ;;  %v977_v49 = vadd.f32 %v976_v41, %v767_v36 }
 0x1e6   : > { %v2147_v43 = vpop.eup %2146  ;;  %v1237_v45 = vmul.f32 %v2145_v22, %v2909_v19  ;;  %2164 = vpow2.f32 %v1627_v27  ;;  %v1944_v0 = vpop.f32.mrb[30].mxu0  ;;  %v2993_v8 = vadd.f32 %v2851_v50, %v985_v40 }
 0x1e7   : > { %v770_v53 = vpop.f32.mrb[31].mxu1  ;;  %v2149_v54 = vpop.eup %2148  ;;  %v1235_v2 = vmul.f32 %v2147_v43, %v2913_v24  ;;  %2166 = vpow2.f32 %v1625_v30  ;;  %v988_v13 = vadd.f32 %v1944_v0, %v1896_v42  ;;  %v2996_v59 = vadd.f32 %v2851_v50, %v977_v49 }
 0x1e8   : > { %v979_v55 = vpop.f32.mrb[31].mxu0  ;;  %v2151_v56 = vpop.eup %2150  ;;  %v1744_v57 = vpack.c.bf16 %v1237_v45, %v1236_v37  ;;  %v1148_v19 = vadd.f32 1.0, %v2149_v54  ;;  %2168 = vpow2.f32 %v1628_v33  ;;  %v1631_v3 = vmul.f32 -1.442695, %v2993_v8 }
 0x1e9   : > { %v2153_v60 = vpop.eup %2152  ;;  %v1739_v62 = vpack.c.bf16 %v1235_v2, %v1234_v38  ;;  %v1146_v63 = vadd.f32 1.0, %v2151_v56  ;;  %2170 = vpow2.f32 %v1626_v47  ;;  %v3001_v5 = vadd.f32 %v2851_v50, %v988_v13 }
 0x1ea   : > { %v2155_v39 = vpop.eup %2154  ;;  %1792 = vst [vmem:[%s2930_s19 + $0x38] sm:$0xff] %v1744_v57   ;;  %2172 = vrcp.f32 %v1148_v19  ;;  %v1149_v24 = vadd.f32 1.0, %v2153_v60  ;;  %v1629_v7 = vmul.f32 -1.442695, %v2996_v59  ;;  %v980_v9 = vadd.f32 %v979_v55, %v770_v53 }
 0x1eb   : > { %1791 = vst [vmem:[%s2930_s19 + $0x30] sm:$0xff] %v1739_v62   ;;  %2174 = vrcp.f32 %v1146_v63  ;;  %v1147_v6 = vadd.f32 1.0, %v2155_v39  ;;  %v1632_v11 = vmul.f32 -1.442695, %v3001_v5 }
 0x1ec   : > { %v2157_v10 = vpop.eup %2156  ;;  %2176 = vrcp.f32 %v1149_v24  ;;  %v3007_v15 = vadd.f32 %v2851_v50, %v980_v9 }
 0x1ed   : > { %v2159_v12 = vpop.eup %2158  ;;  %2178 = vrcp.f32 %v1147_v6  ;;  %v1240_v21 = vmul.f32 %v2157_v10, %v2923_v58 }
 0x1ee   : > { %v2161_v48 = vpop.eup %2160  ;;  %2180 = vpow2.f32 %v1631_v3  ;;  %v1630_v51 = vmul.f32 -1.442695, %v3007_v15  ;;  %v1238_v27 = vmul.f32 %v2159_v12, %v2926_v61 }
 0x1ef   : > { %v2163_v18 = vpop.eup %2162  ;;  %v1241_v23 = vmul.f32 %v2161_v48, %v2937_v1  ;;  %2182 = vpow2.f32 %v1629_v7 }
 0x1f0   : > { %v2165_v26 = vpop.eup %2164  ;;  %v1239_v14 = vmul.f32 %v2163_v18, %v2940_v4  ;;  %2184 = vpow2.f32 %v1632_v11 }
 0x1f1   : > { %v2167_v50 = vpop.eup %2166  ;;  %v1754_v28 = vpack.c.bf16 %v1241_v23, %v1240_v21  ;;  %v1152_v29 = vadd.f32 1.0, %v2165_v26  ;;  %2186 = vpow2.f32 %v1630_v51 }
 0x1f2   : > { %v2169_v30 = vpop.eup %2168  ;;  %v1749_v31 = vpack.c.bf16 %v1239_v14, %v1238_v27  ;;  %v1150_v58 = vadd.f32 1.0, %v2167_v50 }
 0x1f3   : > { %v2171_v20 = vpop.eup %2170  ;;  %1794 = vst [vmem:[%s2930_s19 + $0x48] sm:$0xff] %v1754_v28   ;;  %2188 = vrcp.f32 %v1152_v29  ;;  %v1153_v1 = vadd.f32 1.0, %v2169_v30 }
 0x1f4   : > { %v2173_v33 = vpop.eup %2172  ;;  %1793 = vst [vmem:[%s2930_s19 + $0x40] sm:$0xff] %v1749_v31   ;;  %2190 = vrcp.f32 %v1150_v58  ;;  %v1151_v35 = vadd.f32 1.0, %v2171_v20 }
 0x1f5   : > { %v2175_v36 = vpop.eup %2174  ;;  %2192 = vrcp.f32 %v1153_v1  ;;  %v1244_v22 = vmul.f32 %v2173_v33, %v2949_v32 }
 0x1f6   : > { %v2177_v61 = vpop.eup %2176  ;;  %2194 = vrcp.f32 %v1151_v35  ;;  %v1242_v40 = vmul.f32 %v2175_v36, %v2952_v17 }
 0x1f7   : > { %v2179_v4 = vpop.eup %2178  ;;  %v1245_v37 = vmul.f32 %v2177_v61, %v2959_v46 }
 0x1f8   : > { %v2181_v38 = vpop.eup %2180  ;;  %v1243_v41 = vmul.f32 %v2179_v4, %v2963_v52 }
 0x1f9   : > { %v2183_v42 = vpop.eup %2182  ;;  %v1764_v43 = vpack.c.bf16 %v1245_v37, %v1244_v22  ;;  %v1156_v45 = vadd.f32 1.0, %v2181_v38 }
 0x1fa   : > { %v2185_v47 = vpop.eup %2184  ;;  %v1759_v49 = vpack.c.bf16 %v1243_v41, %v1242_v40  ;;  %v1154_v0 = vadd.f32 1.0, %v2183_v42 }
 0x1fb   : > { %v2187_v53 = vpop.eup %2186  ;;  %1796 = vst [vmem:[%s2930_s19 + $0x58] sm:$0xff] %v1764_v43   ;;  %2196 = vrcp.f32 %v1156_v45  ;;  %v1157_v54 = vadd.f32 1.0, %v2185_v47 }
 0x1fc   : > { %1795 = vst [vmem:[%s2930_s19 + $0x50] sm:$0xff] %v1759_v49   ;;  %2198 = vrcp.f32 %v1154_v0  ;;  %v1155_v32 = vadd.f32 1.0, %v2187_v53 }
 0x1fd   : > { %v2189_v46 = vpop.eup %2188  ;;  %2200 = vrcp.f32 %v1157_v54 }
 0x1fe   : > { %v2191_v17 = vpop.eup %2190  ;;  %2202 = vrcp.f32 %v1155_v32  ;;  %v1248_v13 = vmul.f32 %v2189_v46, %v2971_v44 }
 0x1ff   : > { %v2193_v52 = vpop.eup %2192  ;;  %v1246_v56 = vmul.f32 %v2191_v17, %v2974_v16 }
 0x200   : > { %v2195_v2 = vpop.eup %2194  ;;  %v1249_v55 = vmul.f32 %v2193_v52, %v2977_v25 }
 0x201   : > { %v1247_v57 = vmul.f32 %v2195_v2, %v2985_v34 }
 0x202   : > { %v1774_v19 = vpack.c.bf16 %v1249_v55, %v1248_v13 }
 0x203   : > { %v1769_v60 = vpack.c.bf16 %v1247_v57, %v1246_v56 }
 0x204   : > { %1798 = vst [vmem:[%s2930_s19 + $0x68] sm:$0xff] %v1774_v19  }
 0x205   : > { %v2197_v62 = vpop.eup %2196  ;;  %1797 = vst [vmem:[%s2930_s19 + $0x60] sm:$0xff] %v1769_v60  }
 0x206   : > { %v2199_v63 = vpop.eup %2198  ;;  %v1252_v25 = vmul.f32 %v2197_v62, %v2993_v8 }
 0x207   : > { %v2201_v39 = vpop.eup %2200  ;;  %v1250_v34 = vmul.f32 %v2199_v63, %v2996_v59 }
 0x208   : > { %v2203_v44 = vpop.eup %2202  ;;  %v1253_v16 = vmul.f32 %v2201_v39, %v3001_v5 }
 0x209   : > { %v1251_v24 = vmul.f32 %v2203_v44, %v3007_v15 }
 0x20a   : > { %v1784_v3 = vpack.c.bf16 %v1253_v16, %v1252_v25 }
 0x20b   : > { %v1779_v6 = vpack.c.bf16 %v1251_v24, %v1250_v34 }
 0x20c   : > { %1800 = vst [vmem:[%s2930_s19 + $0x78] sm:$0xff] %v1784_v3  }
 0x20d   : > { %1799 = vst [vmem:[%s2930_s19 + $0x70] sm:$0xff] %v1779_v6  }
 0x20e   : > { %2363 = shalt.err (!%p2360_p1)
}
 0x20f   : > { %s2364_s1 = scalar_lea.hbm %s3037_s26, 2048  ;;  %s2368_s28 = scalar_lea.hbm %s3091_s6, 4096 }
 0x210   : > { %p2365_p5 = scmp.ne.s32.totalorder %s3037_s26, %s2364_s1  ;;  %p2369_p4 = scmp.lt.u32.totalorder %s3037_s26, %s3091_s6 }
 0x211   : > { %p2370_p8 = scmp.lt.u32.totalorder %s2368_s28, %s2364_s1  ;;  %p2372_p3 = scmp.lt.u32.totalorder %s2364_s1, %s3037_s26 }
 0x212   : > { %p2366_p11 = pnand %p2365_p5, %p3140_p7 }
 0x213   : > { %p2371_p13 = por %p2370_p8, %p2369_p4 }
 0x214   : > { %p2367_p12 = pneg %p2366_p11 }
 0x215   : > { %p2373_p0 = por %p2372_p3, %p2371_p13 }
 0x217   : > { %p2374_p6 = pnand %p2373_p0, %p2367_p12 }
 0x219   : > { %2377 = shalt.err (!%p2374_p6)
}
 0x21a   : > { %s2436_s18 = smov 64   ;;  %s2437_s8 = smov 4  }
 0x21b   : > { %1991 = dma.vmem_to_hbm [thread:$0]  (%p3140_p7), %s3039_s12, 2048, %s3037_s26, %s1415_s25, %s2436_s18, %s2436_s18, %s2437_s8  }
 0x21c PF: > { %s3141_s20 = sld [smem:[#allocation19_spill]]  ;;  %s3142_s27 = sld [smem:[#allocation16_spill]] }
 0x21d   : > { %s1443_s19 = sand.u32 1, %s2412_s21  }
 0x21e   : > { %s1444_s14 = scalar_lea.sflag [#allocation4], %s1443_s19 }
 0x222   : > { %p3143_p2 = scmp.ne.s32.totalorder %s3141_s20, 0  ;;  %p3144_p9 = scmp.ge.s32.totalorder %s3142_s27, 2 }
 0x224   : > { %p2011_p10 = pnand %p3144_p9, %p3143_p2 }
 0x226   : > { %2407 = dma.done.wait (!%p2011_p10), %s1444_s14, 2048  }
 0x227   : > { %2409 = vsyncadd (!%p2011_p10), %s1444_s14, 4294965248  ;;  %s3145_s24 = sld [smem:[#allocation17_spill]]  ;;  %s3146_s29 = sld [smem:[#allocation18_spill]] }
 0x228   : > { %s3147_s21 = smov %s2416_s22  ;;  %s3148_s22 = smov %s2420_s23 }
 0x22d   : > { %p23_p1 = scmp.ge.s32.totalorder %s3145_s24, 4   ;;  %s3149_s23 = smov %s3146_s29 }
 0x22f   :  { %25 = sbr.rel (!%p23_p1) target bundleno = 11 (0xb), region = 121 }
 0x236   :  { %1449 = vsyncpa [#allocation3], 1 }
 0x237   :  { %1451 = vsyncpa [#allocation3 + $0x1], 1 }
 0x238   :  { %1452 = vsyncpa [#allocation6], 1 }
 0x239   :  { %1454 = vsyncpa [#allocation6 + $0x1], 1 }
 0x23a   :  { %1455 = vsyncpa [#allocation9], 1 }
 0x23b   :  { %1456 = vsyncpa [#allocation4], 1 }
 0x23c   :  { %1458 = vsyncpa [#allocation4 + $0x1], 1 }

</bundles_post_ra>
